<compile_context>
chip_gen: v7x
topology: tpu7x:2x2x1
jax: 0.10.0
libtpu: 0.0.40
codegen_flags: <defaults>
</compile_context>

<pallas_src>
import jax
import jax.numpy as jnp
from jax.experimental import pallas as pl
from jax.experimental.pallas import tpu as pltpu


# ---------------------------------------------------------------------------
# Kernels
# ---------------------------------------------------------------------------
def _drop_path_kernel(x_ref, scale_ref, o_ref):
    # x_ref / o_ref: (TB, TF); scale_ref: (TB, 1) in x.dtype, broadcasts over lanes.
    o_ref[...] = x_ref[...] * scale_ref[...]


def _drop_path_residual_kernel(x_ref, scale_ref, res_ref, o_ref):
    # Fused residual add: o = res + x * scale.
    o_ref[...] = res_ref[...] + x_ref[...] * scale_ref[...]


# ---------------------------------------------------------------------------
# Tiling helpers
# ---------------------------------------------------------------------------
def _cdiv(a, b):
    return -(-a // b)


def _round_up(v, m):
    return ((v + m - 1) // m) * m


def _round_down(v, m):
    return (v // m) * m


def _gen_params():
    """Per-TPU-generation tuning: (target tile bytes, scoped-VMEM budget,
    minimum number of parallel grid blocks to keep all TensorCores busy)."""
    kind = ""
    try:
        kind = jax.devices()[0].device_kind.lower()
    except Exception:
        pass
    if "v7" in kind:   # 2 TCs/chip, 64 MiB VMEM (32 MiB scoped default), ~3.2 TB/s HBM
        return {"target_tile_bytes": 6 << 20, "scoped_vmem": 32 << 20,
                "min_parallel_blocks": 2}
    if "v6" in kind:   # 1 TC/chip, 128 MiB VMEM (32 MiB scoped default)
        return {"target_tile_bytes": 4 << 20, "scoped_vmem": 32 << 20,
                "min_parallel_blocks": 1}
    # v5e or unknown: conservative (16 MiB scoped default).
    return {"target_tile_bytes": 2 << 20, "scoped_vmem": 16 << 20,
            "min_parallel_blocks": 1}


def _select_tiles(B, F, itemsize, n_streams, params):
    sub_align = 8 if itemsize >= 4 else (16 if itemsize == 2 else 32)

    # Cap the tile so (2 double buffers x n_streams tile-sized arrays) stays
    # comfortably inside the default scoped-VMEM budget of the generation.
    tile_budget = max(sub_align * 128 * itemsize,
                      (params["scoped_vmem"] - (2 << 20)) // (2 * n_streams))
    target_tile_bytes = min(params["target_tile_bytes"], tile_budget)

    row_bytes = F * itemsize
    if sub_align * row_bytes <= target_tile_bytes:
        # Full, contiguous rows per block: one long HBM run per sample row.
        TF = F
        TB = max(sub_align, _round_down(target_tile_bytes // row_bytes, sub_align))
        if TB >= B:
            TB = B                      # full extent is always a legal block dim
    else:
        # A full row does not fit -> split the lane (feature) dim.
        TB = B if B <= sub_align else sub_align
        TF = max(128, _round_down(target_tile_bytes // (max(TB, 1) * itemsize), 128))
        if TF >= F:
            TF = F

    # v7x: make sure at least one "parallel" axis has >= 2 blocks so the
    # second TensorCore does not idle.
    if params["min_parallel_blocks"] > 1 and _cdiv(B, TB) * _cdiv(F, TF) < 2:
        if F >= 2 * 128:
            TF = max(128, min(_round_up((F + 1) // 2, 128), _round_down(F - 1, 128)))
        elif B >= 2 * sub_align:
            TB = _round_up((B + 1) // 2, sub_align)
        # else: total work is tiny, a single block is fine.

    return TB, TF


# ---------------------------------------------------------------------------
# Public wrapper
# ---------------------------------------------------------------------------
def drop_path(x, *, dropout=0.0, training=True, key=None, seed=0, residual=None):
    """JAX/Pallas equivalent of DropPath.forward (per-sample stochastic depth).

    If `residual` is given, returns `residual + drop_path(x)` fused in one
    kernel (one fewer HBM round-trip than a separate add).
    Pass a distinct `key` (or `seed`) per layer / step for independent masks.
    """
    assert 0.0 <= dropout <= 1.0
    keep_prob = float(1.0 - dropout)

    # keep_prob == 1 or eval mode -> identity (same as the torch module).
    if keep_prob == 1.0 or not training:
        return x if residual is None else residual + x
    # dropout == 1: every sample dropped.  (torch would produce NaN via inf*0;
    # zeros is the well-defined intent of stochastic depth.)
    if keep_prob == 0.0:
        return jnp.zeros_like(x) if residual is None else residual

    B = x.shape[0]
    F = 1
    for d in x.shape[1:]:
        F *= d
    x2 = x.reshape(B, F)

    # Per-sample keep mask computed once in the wrapper (torch semantics:
    # mask = floor(keep_prob + rand)), folded with 1/keep_prob into a single
    # per-sample scale, pre-cast to the input dtype.
    if key is None:
        key = jax.random.PRNGKey(seed)
    u = jax.random.uniform(key, (B, 1), dtype=jnp.float32)
    scale = (jnp.floor(keep_prob + u) * (1.0 / keep_prob)).astype(x.dtype)  # (B, 1)

    params = _gen_params()
    n_streams = 3 if residual is not None else 2        # tile-sized arrays in flight
    itemsize = jnp.dtype(x.dtype).itemsize
    TB, TF = _select_tiles(B, F, itemsize, n_streams, params)

    grid = (pl.cdiv(B, TB), pl.cdiv(F, TF))

    in_specs = [
        pl.BlockSpec((TB, TF), lambda i, j: (i, j)),     # x tile
        pl.BlockSpec((TB, 1), lambda i, j: (i, 0)),      # per-sample scale column
    ]
    operands = [x2, scale]
    kernel = _drop_path_kernel
    if residual is not None:
        assert residual.shape == x.shape
        res2 = residual.astype(x.dtype).reshape(B, F)
        in_specs.append(pl.BlockSpec((TB, TF), lambda i, j: (i, j)))
        operands.append(res2)
        kernel = _drop_path_residual_kernel

    out2 = pl.pallas_call(
        kernel,
        out_shape=jax.ShapeDtypeStruct((B, F), x.dtype),
        grid=grid,
        in_specs=in_specs,
        out_specs=pl.BlockSpec((TB, TF), lambda i, j: (i, j)),
        compiler_params=pltpu.CompilerParams(
            dimension_semantics=("parallel", "parallel")),
    )(*operands)

    return out2.reshape(x.shape)


# ---------------------------------------------------------------------------
# Self-test
# ---------------------------------------------------------------------------
if __name__ == "__main__":
    root = jax.random.PRNGKey(0)
    kx, kr, kd = jax.random.split(root, 3)
    # Small NCHW input consistent with a Swin-style feature map.
    x = jax.random.normal(kx, (2, 4, 16, 16), dtype=jnp.float32)
    res = jax.random.normal(kr, (2, 4, 16, 16), dtype=jnp.float32)

    dropout = 0.3
    keep_prob = 1.0 - dropout

    out = jax.block_until_ready(drop_path(x, dropout=dropout, training=True, key=kd))

    # Each sample must be either dropped (all zeros) or scaled by 1/keep_prob,
    # matching the torch forward semantics.
    ok = True
    for b in range(x.shape[0]):
        scaled = x[b] / keep_prob
        is_kept = bool(jnp.allclose(out[b], scaled, atol=1e-5))
        is_dropped = bool(jnp.allclose(out[b], jnp.zeros_like(out[b]), atol=1e-7))
        ok = ok and (is_kept or is_dropped)

    # Fused residual path (same key -> same mask): out_res == res + out.
    out_res = jax.block_until_ready(
        drop_path(x, dropout=dropout, training=True, key=kd, residual=res))
    ok = ok and bool(jnp.allclose(out_res, res + out, atol=1e-5))

    # Eval-mode / keep_prob==1 identity paths.
    out_eval = jax.block_until_ready(drop_path(x, dropout=dropout, training=False))
    ok = ok and bool(jnp.array_equal(out_eval, x))
    out_nodrop = jax.block_until_ready(drop_path(x, dropout=0.0, training=True))
    ok = ok and bool(jnp.array_equal(out_nodrop, x))

    assert ok, "DropPath kernel output does not match expected semantics"
    print("KERNEL_OK")
</pallas_src>

<mosaic_0001>
module attributes {stable_mosaic.version = 11 : i64} {
  func.func @_drop_path_kernel(%arg0: i32, %arg1: i32, %arg2: memref<2x1024xf32, #tpu.memory_space<vmem>>, %arg3: memref<2x1xf32, #tpu.memory_space<vmem>>, %arg4: memref<2x1024xf32, #tpu.memory_space<vmem>>) attributes {dimension_semantics = [#tpu.dimension_semantics<parallel>, #tpu.dimension_semantics<parallel>], iteration_bounds = array<i64: 1, 1>, scalar_prefetch = 0 : i64, scratch_operands = 0 : i64, tpu.core_type = #tpu.core_type<tc>, window_params = [{transform_indices = @transform_0, window_bounds = array<i64: 2, 1024>}, {transform_indices = @transform_1, window_bounds = array<i64: 2, 1>}, {transform_indices = @transform_2, window_bounds = array<i64: 2, 1024>}]} {
    %c0 = arith.constant 0 : index
    %c0_0 = arith.constant 0 : index
    %0 = vector.load %arg2[%c0, %c0_0] : memref<2x1024xf32, #tpu.memory_space<vmem>>, vector<2x1024xf32>
    %c0_1 = arith.constant 0 : index
    %c0_2 = arith.constant 0 : index
    %1 = vector.load %arg3[%c0_1, %c0_2] : memref<2x1xf32, #tpu.memory_space<vmem>>, vector<2x1xf32>
    %2 = vector.broadcast %1 : vector<2x1xf32> to vector<2x1024xf32>
    %3 = arith.mulf %0, %2 : vector<2x1024xf32>
    %c0_3 = arith.constant 0 : index
    %c0_4 = arith.constant 0 : index
    %4 = vector.load %arg4[%c0_3, %c0_4] : memref<2x1024xf32, #tpu.memory_space<vmem>>, vector<2x1024xf32>
    tpu.vector_store %arg4[%c0_3, %c0_4], %3 {strides = array<i32>} : memref<2x1024xf32, #tpu.memory_space<vmem>>, vector<2x1024xf32>,
    return
  }
  func.func @transform_0(%arg0: i32, %arg1: i32) -> (i32, i32) {
    %c0_i32 = arith.constant 0 : i32
    return %arg0, %arg1 : i32, i32
  }
  func.func @transform_1(%arg0: i32, %arg1: i32) -> (i32, i32) {
    %c0_i32 = arith.constant 0 : i32
    %c0_i32_0 = arith.constant 0 : i32
    return %arg0, %c0_i32 : i32, i32
  }
  func.func @transform_2(%arg0: i32, %arg1: i32) -> (i32, i32) {
    %c0_i32 = arith.constant 0 : i32
    return %arg0, %arg1 : i32, i32
  }
}

</mosaic_0001>

<bundles_post_ra>
// kernel: tpu_custom_call.1
= control target key start
LH: loop header
LB: loop body
LE: loop exit
PB: predicated region body
PF: predicated region fallthrough
CT: control target
= control target key end

     0   :  { %7 = vsyncpa [#allocation3], 0  ;;  %s157_s0 = inlined_call_operand.hbm [shape: f32[2,1024], index: 0, kind: input, shape index: {}]   ;;  %s158_s1 = inlined_call_operand.vmem [shape: f32[2,1], index: 1, kind: input, shape index: {}]   ;;  %s159_s2 = inlined_call_operand.hbm [shape: f32[2,1024], index: 2, kind: output, shape index: {}]  }
   0x1   :  { %8 = vsyncpa [#allocation4], 0  ;;  %s111_s9 = smov [#allocation2]   ;;  %s63_s13 = scalar_lea.hbm %s157_s0, 256 }
   0x2   :  { %s15_s10 = sshll.u32 %s111_s9, 4  ;;  %p64_p0 = scmp.ne.s32.totalorder %s157_s0, %s63_s13  ;;  %s16_s10 = int_to_ptr.vmem [resolvable:$true] %s15_s10 }
   0x3   :  { %p67_p1 = scmp.lt.u32.totalorder %s63_s13, %s157_s0 }
   0x5   :  { %p69_p2 = pnand %p67_p1, %p64_p0 }
   0x7   :  { %72 = shalt.err (!%p69_p2)
}
   0x8   :  { %s73_s18 = scalar_lea.vmem %s16_s10, 256  ;;  %p78_p4 = scmp.lt.s32.totalorder %s16_s10, %s16_s10 }
   0x9   :  { %p74_p3 = scmp.ne.s32.totalorder %s16_s10, %s73_s18  ;;  %p79_p5 = scmp.lt.s32.totalorder %s73_s18, %s73_s18 }
   0xb   :  { %p80_p6 = por %p79_p5, %p78_p4 }
   0xd   :  { %p81_p7 = pnand %p80_p6, %p74_p3 }
   0xf   :  { %84 = shalt.err (!%p81_p7)
}
  0x10   :  { %18 = dma.hbm_to_vmem [thread:$0]  %s157_s0, 256, %s16_s10, [#allocation3]  }
  0x11   :  { %107 = dma.done.wait [#allocation3], 256  }
  0x12   :  { %108 = vsyncadd [#allocation3], 4294967040  ;;  %v112_v0 = vmov 0   ;;  %v26_v1 = vld [vmem:[%s158_s1] sm:$0x3]  ;;  %v34_v4 = vlaneseq  ;;  %v25_v10 = vld [vmem:[#allocation2 + $0x8] sm:$0xff] }
  0x13   :  { %62 = vset.pattern.permute.xlu0 %v112_v0  ;;  %v113_v2 = vmov 269488144   ;;  %v24_v9 = vld [vmem:[#allocation2] sm:$0xff]  ;;  %s114_s23 = smov [#allocation5]  }
  0x14   :  { %29 = vperm.xlu0 %62, %v26_v1   ;;  %v32_v3 = vunpack.c.l.s4 %v113_v2  ;;  %v35_v6 = vshrl.u32 %v34_v4, 7  ;;  %s49_s0 = sshll.u32 %s114_s23, 4  ;;  %s50_s0 = int_to_ptr.vmem [resolvable:$true] %s49_s0 }
  0x15   :  { %s85_s24 = scalar_lea.vmem %s50_s0, 256  ;;  %p90_p9 = scmp.lt.s32.totalorder %s50_s0, %s50_s0 }
  0x16   :  { %v33_v5 = vunpack.c.0.s8 %v32_v3  ;;  %p86_p8 = scmp.ne.s32.totalorder %s50_s0, %s85_s24  ;;  %p91_p10 = scmp.lt.s32.totalorder %s85_s24, %s85_s24 }
  0x18   :  { %v36_v7 = vsub.s32 %v33_v5, %v35_v6  ;;  %p92_p11 = por %p91_p10, %p90_p9 }
  0x1a   :  { %p93_p12 = pnand %p92_p11, %p86_p8 }
  0x93   :  { %v30_v8 = vpop.permute.xlu0 %29 }
  0x94   :  { %v37_v11 = vrot.slane %v30_v8, %v36_v7 }
  0x96   :  { %v39_v12 = vmul.f32 %v37_v11, %v24_v9  ;;  %v40_v13 = vmul.f32 %v37_v11, %v25_v10 }
  0x98   :  { %41 = vst [vmem:[#allocation5] sm:$0xff] %v39_v12  ;;  %42 = vst [vmem:[#allocation5 + $0x8] sm:$0xff] %v40_v13 }
  0x99   :  { %96 = shalt.err (!%p93_p12)
}
  0x9a   :  { %s97_s26 = scalar_lea.hbm %s159_s2, 256 }
  0x9b   :  { %p98_p13 = scmp.ne.s32.totalorder %s159_s2, %s97_s26  ;;  %p101_p0 = scmp.lt.u32.totalorder %s97_s26, %s159_s2 }
  0x9d   :  { %p103_p1 = pnand %p101_p0, %p98_p13 }
  0x9f   :  { %106 = shalt.err (!%p103_p1)
}
  0xa0   :  { %52 = dma.vmem_to_hbm [thread:$0]  %s50_s0, 256, %s159_s2, [#allocation4]  }
  0xa1   :  { %109 = dma.done.wait [#allocation4], 256  }
  0xa2   :  { %110 = vsyncadd [#allocation4], 4294967040 }
  0xa3   :  { %56 = vsyncpa [#allocation3], 1 }
  0xa4   :  { %57 = vsyncpa [#allocation4], 1 }

</bundles_post_ra>
